<compile_context>
chip_gen: v5e
topology: v5e:2x2
jax: 0.10.0
libtpu: 0.0.40
codegen_flags: <defaults>
</compile_context>

<pallas_src>
import functools

import jax
import jax.numpy as jnp
from jax import lax
from jax.experimental import pallas as pl
from jax.experimental.pallas import tpu as pltpu

_EPS = 1e-5
_VMEM_LIMIT = 48 * 1024 * 1024


def _round_up(v, m):
    return (v + m - 1) // m * m


def _silu(x, approx):
    # silu(x) = x * sigmoid(x) = x * 1 / (1 + exp(-x)).
    # exp lowers to the EUP; with approx=True the reciprocal does too.
    return x * pl.reciprocal(1.0 + jnp.exp(-x), approx=approx)


def _bn_apply(x, sum_v, sq_v, gamma, beta, inv_n):
    # Single-pass batch stats: var = E[x^2] - E[x]^2, biased, eps=1e-5.
    mean = sum_v * inv_n
    var = sq_v * inv_n - mean * mean
    return (x - mean) * lax.rsqrt(var + _EPS) * gamma + beta


# -------- pass 1: per-feature sum / sum-of-squares of x (bn1 stats) ---------
def _stats_kernel(x_ref, sum_ref, sq_ref):
    i = pl.program_id(0)
    x = x_ref[...].astype(jnp.float32)

    @pl.when(i == 0)
    def _():
        sum_ref[...] = jnp.zeros_like(sum_ref)
        sq_ref[...] = jnp.zeros_like(sq_ref)

    sum_ref[...] += jnp.sum(x, axis=0, keepdims=True)
    sq_ref[...] += jnp.sum(x * x, axis=0, keepdims=True)


# ------ pass 2: y = fc1(silu(bn1(x))) and per-feature sum/sumsq of y --------
def _fc1_kernel(x_ref, xsum_ref, xsq_ref, g1_ref, be1_ref, w1_ref, b1_ref,
                y_ref, ysum_ref, ysq_ref, *,
                inv_n, n_true, tile_n, matmul_dtype, approx, need_mask):
    i = pl.program_id(0)
    x = x_ref[...].astype(jnp.float32)

    h = _bn_apply(x, xsum_ref[...], xsq_ref[...], g1_ref[...], be1_ref[...],
                  inv_n)
    h = _silu(h, approx)

    # x @ W^T : contract the last dims of both operands (no weight transpose).
    y = lax.dot_general(h.astype(matmul_dtype), w1_ref[...],
                        (((1,), (1,)), ((), ())),
                        preferred_element_type=jnp.float32) + b1_ref[...]

    if need_mask:
        # Batch rows were zero-padded to a tile multiple; keep padded rows out
        # of the bn2 batch statistics (and write zeros for them).
        rows = lax.broadcasted_iota(jnp.int32, y.shape, 0) + i * tile_n
        y = jnp.where(rows < n_true, y, 0.0)

    y_ref[...] = y.astype(y_ref.dtype)

    @pl.when(i == 0)
    def _():
        ysum_ref[...] = jnp.zeros_like(ysum_ref)
        ysq_ref[...] = jnp.zeros_like(ysq_ref)

    ysum_ref[...] += jnp.sum(y, axis=0, keepdims=True)
    ysq_ref[...] += jnp.sum(y * y, axis=0, keepdims=True)


# ----------------- pass 3: out = fc2(silu(bn2(y))) + x ----------------------
def _fc2_kernel(y_ref, x_ref, ysum_ref, ysq_ref, g2_ref, be2_ref, w2_ref,
                b2_ref, o_ref, *, inv_n, matmul_dtype, approx):
    x = x_ref[...].astype(jnp.float32)
    y = y_ref[...].astype(jnp.float32)

    h = _bn_apply(y, ysum_ref[...], ysq_ref[...], g2_ref[...], be2_ref[...],
                  inv_n)
    h = _silu(h, approx)

    out = lax.dot_general(h.astype(matmul_dtype), w2_ref[...],
                          (((1,), (1,)), ((), ())),
                          preferred_element_type=jnp.float32) + b2_ref[...]

    o_ref[...] = (out + x).astype(o_ref.dtype)


@functools.partial(jax.jit, static_argnames=("use_bf16", "tile_n_max"))
def residual_forward(x, w1, b1, w2, b2, g1, be1, g2, be2, *,
                     use_bf16=True, tile_n_max=512):
    """x: (N, C); w1: (C, C); w2: (C, C). Returns (N, C)."""
    n, c_in = x.shape
    c_out, c_in_w = w1.shape
    assert c_in_w == c_in
    assert w2.shape == (c_out, c_out)
    assert c_in == c_out, "residual add requires in_channels == out_channels"

    f32 = jnp.float32
    mm_dtype = jnp.bfloat16 if use_bf16 else jnp.float32
    approx = bool(use_bf16)  # exact reciprocal on the f32 verification path

    # --- lane-dense channel padding (multiple of 128) + batch tile padding ---
    c_pad = _round_up(c_out, 128)
    if n <= tile_n_max:
        tile_n, n_pad = n, n
    else:
        tile_n = tile_n_max
        n_pad = _round_up(n, tile_n)
    n_tiles = n_pad // tile_n
    need_mask = n_pad != n

    def pad2(a, rows, cols):
        return jnp.pad(a.astype(f32),
                       ((0, rows - a.shape[0]), (0, cols - a.shape[1])))

    xp = pad2(x, n_pad, c_pad)
    w1p = pad2(w1, c_pad, c_pad).astype(mm_dtype)
    w2p = pad2(w2, c_pad, c_pad).astype(mm_dtype)
    b1p = pad2(b1.reshape(1, -1), 1, c_pad)
    b2p = pad2(b2.reshape(1, -1), 1, c_pad)
    g1p = pad2(g1.reshape(1, -1), 1, c_pad)
    be1p = pad2(be1.reshape(1, -1), 1, c_pad)
    g2p = pad2(g2.reshape(1, -1), 1, c_pad)
    be2p = pad2(be2.reshape(1, -1), 1, c_pad)

    inv_n = 1.0 / float(n)  # batch stats always divide by the TRUE batch size

    row_spec = pl.BlockSpec((tile_n, c_pad), lambda i: (i, 0))

    def full(shape):
        return pl.BlockSpec(shape, lambda i: (0, 0))  # resident across tiles

    cparams_arb = pltpu.CompilerParams(
        dimension_semantics=("arbitrary",), vmem_limit_bytes=_VMEM_LIMIT)
    cparams_par = pltpu.CompilerParams(
        dimension_semantics=("parallel",), vmem_limit_bytes=_VMEM_LIMIT)

    # -------- pass 1: bn1 batch stats --------
    xsum, xsq = pl.pallas_call(
        _stats_kernel,
        out_shape=(jax.ShapeDtypeStruct((1, c_pad), f32),
                   jax.ShapeDtypeStruct((1, c_pad), f32)),
        grid=(n_tiles,),
        in_specs=[row_spec],
        out_specs=(full((1, c_pad)), full((1, c_pad))),
        compiler_params=cparams_arb,
    )(xp)

    # -------- pass 2: fc1 + bn2 batch stats --------
    fc1 = functools.partial(_fc1_kernel, inv_n=inv_n, n_true=n, tile_n=tile_n,
                            matmul_dtype=mm_dtype, approx=approx,
                            need_mask=need_mask)
    y, ysum, ysq = pl.pallas_call(
        fc1,
        out_shape=(jax.ShapeDtypeStruct((n_pad, c_pad), f32),
                   jax.ShapeDtypeStruct((1, c_pad), f32),
                   jax.ShapeDtypeStruct((1, c_pad), f32)),
        grid=(n_tiles,),
        in_specs=[row_spec, full((1, c_pad)), full((1, c_pad)),
                  full((1, c_pad)), full((1, c_pad)),
                  full((c_pad, c_pad)), full((1, c_pad))],
        out_specs=(row_spec, full((1, c_pad)), full((1, c_pad))),
        compiler_params=cparams_arb,
    )(xp, xsum, xsq, g1p, be1p, w1p, b1p)

    # -------- pass 3: fc2 + residual (no accumulator -> parallel axis) -------
    fc2 = functools.partial(_fc2_kernel, inv_n=inv_n, matmul_dtype=mm_dtype,
                            approx=approx)
    out = pl.pallas_call(
        fc2,
        out_shape=jax.ShapeDtypeStruct((n_pad, c_pad), x.dtype),
        grid=(n_tiles,),
        in_specs=[row_spec, row_spec, full((1, c_pad)), full((1, c_pad)),
                  full((1, c_pad)), full((1, c_pad)),
                  full((c_pad, c_pad)), full((1, c_pad))],
        out_specs=row_spec,
        compiler_params=cparams_par,
    )(y, xp, ysum, ysq, g2p, be2p, w2p, b2p)

    return out[:n, :c_out]


def _reference(x, w1, b1, w2, b2, g1, be1, g2, be2):
    def bn(v, g, b):
        mean = jnp.mean(v, axis=0, keepdims=True)
        var = jnp.mean((v - mean) ** 2, axis=0, keepdims=True)
        return (v - mean) / jnp.sqrt(var + _EPS) * g + b

    def silu(v):
        return v * jax.nn.sigmoid(v)

    h = silu(bn(x, g1, be1))
    y = h @ w1.T + b1
    h2 = silu(bn(y, g2, be2))
    y2 = h2 @ w2.T + b2
    return y2 + x


if __name__ == "__main__":
    # Small shapes: batch=8, in_channels == out_channels == 32
    N, C_IN, C_OUT = 8, 32, 32

    key = jax.random.PRNGKey(0)
    kx, k1, k2 = jax.random.split(key, 3)

    x = jax.random.normal(kx, (N, C_IN), dtype=jnp.float32)

    # Deterministic parameter init mirroring reset_parameters():
    #   kaiming_normal_(fan_out, relu) -> std = sqrt(2 / out_features)
    std = (2.0 / C_OUT) ** 0.5
    w1 = std * jax.random.normal(k1, (C_OUT, C_IN), dtype=jnp.float32)
    b1 = jnp.zeros((C_OUT,), dtype=jnp.float32)
    w2 = std * jax.random.normal(k2, (C_OUT, C_OUT), dtype=jnp.float32)
    b2 = jnp.zeros((C_OUT,), dtype=jnp.float32)
    # BatchNorm affine params: weight=1, bias=0
    g1 = jnp.ones((C_IN,), dtype=jnp.float32)
    be1 = jnp.zeros((C_IN,), dtype=jnp.float32)
    g2 = jnp.ones((C_OUT,), dtype=jnp.float32)
    be2 = jnp.zeros((C_OUT,), dtype=jnp.float32)

    ref = _reference(x, w1, b1, w2, b2, g1, be1, g2, be2)

    # Exact-math path (f32 MXU inputs, exact reciprocal): tight tolerance.
    out_f32 = jax.block_until_ready(
        residual_forward(x, w1, b1, w2, b2, g1, be1, g2, be2, use_bf16=False))
    assert out_f32.shape == (N, C_OUT)
    assert jnp.allclose(out_f32, ref, atol=1e-4, rtol=1e-4), "f32 path mismatch"

    # Fast path (bf16 MXU inputs + f32 accumulation, EUP approx reciprocal):
    # small expected drift vs the f32 reference.
    out_bf16 = jax.block_until_ready(
        residual_forward(x, w1, b1, w2, b2, g1, be1, g2, be2, use_bf16=True))
    assert out_bf16.shape == (N, C_OUT)
    assert jnp.allclose(out_bf16, ref, atol=5e-2, rtol=5e-2), \
        "bf16 path mismatch"

    print("KERNEL_OK")
</pallas_src>

<mosaic_0001>
module attributes {stable_mosaic.version = 11 : i64} {
  func.func @_stats_kernel(%arg0: i32, %arg1: memref<8x128xf32, #tpu.memory_space<vmem>>, %arg2: memref<1x128xf32, #tpu.memory_space<vmem>>, %arg3: memref<1x128xf32, #tpu.memory_space<vmem>>) attributes {dimension_semantics = [#tpu.dimension_semantics<arbitrary>], iteration_bounds = array<i64: 1>, scalar_prefetch = 0 : i64, scratch_operands = 0 : i64, tpu.core_type = #tpu.core_type<tc>, window_params = [{transform_indices = @transform_0, window_bounds = array<i64: 8, 128>}, {pipeline_mode = #tpu.pipeline_mode<synchronous>, transform_indices = @transform_1, window_bounds = array<i64: 1, 128>}, {pipeline_mode = #tpu.pipeline_mode<synchronous>, transform_indices = @transform_2, window_bounds = array<i64: 1, 128>}]} {
    %c0 = arith.constant 0 : index
    %c0_0 = arith.constant 0 : index
    %0 = vector.load %arg1[%c0, %c0_0] : memref<8x128xf32, #tpu.memory_space<vmem>>, vector<8x128xf32>
    %c0_i32 = arith.constant 0 : i32
    %1 = arith.cmpi eq, %arg0, %c0_i32 : i32
    %2 = arith.extui %1 : i1 to i32
    %c0_i32_1 = arith.constant 0 : i32
    %3 = arith.cmpi ne, %2, %c0_i32_1 : i32
    scf.if %3 {
      %cst_11 = arith.constant 0.000000e+00 : f32
      %15 = vector.broadcast %cst_11 : f32 to vector<1x128xf32>
      %c0_12 = arith.constant 0 : index
      %c0_13 = arith.constant 0 : index
      %16 = vector.load %arg2[%c0_12, %c0_13] : memref<1x128xf32, #tpu.memory_space<vmem>>, vector<1x128xf32>
      tpu.vector_store %arg2[%c0_12, %c0_13], %15 {strides = array<i32>} : memref<1x128xf32, #tpu.memory_space<vmem>>, vector<1x128xf32>,
      %cst_14 = arith.constant 0.000000e+00 : f32
      %17 = vector.broadcast %cst_14 : f32 to vector<1x128xf32>
      %c0_15 = arith.constant 0 : index
      %c0_16 = arith.constant 0 : index
      %18 = vector.load %arg3[%c0_15, %c0_16] : memref<1x128xf32, #tpu.memory_space<vmem>>, vector<1x128xf32>
      tpu.vector_store %arg3[%c0_15, %c0_16], %17 {strides = array<i32>} : memref<1x128xf32, #tpu.memory_space<vmem>>, vector<1x128xf32>,
    } else {
    }
    %c0_2 = arith.constant 0 : index
    %c0_3 = arith.constant 0 : index
    %4 = vector.load %arg2[%c0_2, %c0_3] : memref<1x128xf32, #tpu.memory_space<vmem>>, vector<1x128xf32>
    %cst = arith.constant dense<0.000000e+00> : vector<128xf32>
    %5 = vector.multi_reduction <add>, %0, %cst [0] : vector<8x128xf32> to vector<128xf32>
    %6 = vector.shape_cast %5 : vector<128xf32> to vector<1x128xf32>
    %7 = arith.addf %4, %6 : vector<1x128xf32>
    %c0_4 = arith.constant 0 : index
    %c0_5 = arith.constant 0 : index
    %8 = vector.load %arg2[%c0_4, %c0_5] : memref<1x128xf32, #tpu.memory_space<vmem>>, vector<1x128xf32>
    tpu.vector_store %arg2[%c0_4, %c0_5], %7 {strides = array<i32>} : memref<1x128xf32, #tpu.memory_space<vmem>>, vector<1x128xf32>,
    %c0_6 = arith.constant 0 : index
    %c0_7 = arith.constant 0 : index
    %9 = vector.load %arg3[%c0_6, %c0_7] : memref<1x128xf32, #tpu.memory_space<vmem>>, vector<1x128xf32>
    %10 = arith.mulf %0, %0 : vector<8x128xf32>
    %cst_8 = arith.constant dense<0.000000e+00> : vector<128xf32>
    %11 = vector.multi_reduction <add>, %10, %cst_8 [0] : vector<8x128xf32> to vector<128xf32>
    %12 = vector.shape_cast %11 : vector<128xf32> to vector<1x128xf32>
    %13 = arith.addf %9, %12 : vector<1x128xf32>
    %c0_9 = arith.constant 0 : index
    %c0_10 = arith.constant 0 : index
    %14 = vector.load %arg3[%c0_9, %c0_10] : memref<1x128xf32, #tpu.memory_space<vmem>>, vector<1x128xf32>
    tpu.vector_store %arg3[%c0_9, %c0_10], %13 {strides = array<i32>} : memref<1x128xf32, #tpu.memory_space<vmem>>, vector<1x128xf32>,
    return
  }
  func.func @transform_0(%arg0: i32) -> (i32, i32) {
    %c0_i32 = arith.constant 0 : i32
    %c0_i32_0 = arith.constant 0 : i32
    return %arg0, %c0_i32 : i32, i32
  }
  func.func @transform_1(%arg0: i32) -> (i32, i32) {
    %c0_i32 = arith.constant 0 : i32
    %c0_i32_0 = arith.constant 0 : i32
    %c0_i32_1 = arith.constant 0 : i32
    return %c0_i32, %c0_i32_0 : i32, i32
  }
  func.func @transform_2(%arg0: i32) -> (i32, i32) {
    %c0_i32 = arith.constant 0 : i32
    %c0_i32_0 = arith.constant 0 : i32
    %c0_i32_1 = arith.constant 0 : i32
    return %c0_i32, %c0_i32_0 : i32, i32
  }
}

module attributes {stable_mosaic.version = 11 : i64} {
  func.func @_fc2_kernel(%arg0: i32, %arg1: memref<8x128xf32, #tpu.memory_space<vmem>>, %arg2: memref<8x128xf32, #tpu.memory_space<vmem>>, %arg3: memref<1x128xf32, #tpu.memory_space<vmem>>, %arg4: memref<1x128xf32, #tpu.memory_space<vmem>>, %arg5: memref<1x128xf32, #tpu.memory_space<vmem>>, %arg6: memref<1x128xf32, #tpu.memory_space<vmem>>, %arg7: memref<128x128xf32, #tpu.memory_space<vmem>>, %arg8: memref<1x128xf32, #tpu.memory_space<vmem>>, %arg9: memref<8x128xf32, #tpu.memory_space<vmem>>) attributes {dimension_semantics = [#tpu.dimension_semantics<parallel>], iteration_bounds = array<i64: 1>, scalar_prefetch = 0 : i64, scratch_operands = 0 : i64, tpu.core_type = #tpu.core_type<tc>, window_params = [{transform_indices = @transform_0, window_bounds = array<i64: 8, 128>}, {transform_indices = @transform_1, window_bounds = array<i64: 8, 128>}, {pipeline_mode = #tpu.pipeline_mode<synchronous>, transform_indices = @transform_2, window_bounds = array<i64: 1, 128>}, {pipeline_mode = #tpu.pipeline_mode<synchronous>, transform_indices = @transform_3, window_bounds = array<i64: 1, 128>}, {pipeline_mode = #tpu.pipeline_mode<synchronous>, transform_indices = @transform_4, window_bounds = array<i64: 1, 128>}, {pipeline_mode = #tpu.pipeline_mode<synchronous>, transform_indices = @transform_5, window_bounds = array<i64: 1, 128>}, {pipeline_mode = #tpu.pipeline_mode<synchronous>, transform_indices = @transform_6, window_bounds = array<i64: 128, 128>}, {pipeline_mode = #tpu.pipeline_mode<synchronous>, transform_indices = @transform_7, window_bounds = array<i64: 1, 128>}, {transform_indices = @transform_8, window_bounds = array<i64: 8, 128>}]} {
    %c0 = arith.constant 0 : index
    %c0_0 = arith.constant 0 : index
    %0 = vector.load %arg2[%c0, %c0_0] : memref<8x128xf32, #tpu.memory_space<vmem>>, vector<8x128xf32>
    %c0_1 = arith.constant 0 : index
    %c0_2 = arith.constant 0 : index
    %1 = vector.load %arg1[%c0_1, %c0_2] : memref<8x128xf32, #tpu.memory_space<vmem>>, vector<8x128xf32>
    %c0_3 = arith.constant 0 : index
    %c0_4 = arith.constant 0 : index
    %2 = vector.load %arg3[%c0_3, %c0_4] : memref<1x128xf32, #tpu.memory_space<vmem>>, vector<1x128xf32>
    %c0_5 = arith.constant 0 : index
    %c0_6 = arith.constant 0 : index
    %3 = vector.load %arg4[%c0_5, %c0_6] : memref<1x128xf32, #tpu.memory_space<vmem>>, vector<1x128xf32>
    %c0_7 = arith.constant 0 : index
    %c0_8 = arith.constant 0 : index
    %4 = vector.load %arg5[%c0_7, %c0_8] : memref<1x128xf32, #tpu.memory_space<vmem>>, vector<1x128xf32>
    %c0_9 = arith.constant 0 : index
    %c0_10 = arith.constant 0 : index
    %5 = vector.load %arg6[%c0_9, %c0_10] : memref<1x128xf32, #tpu.memory_space<vmem>>, vector<1x128xf32>
    %cst = arith.constant 1.250000e-01 : f32
    %6 = vector.broadcast %cst : f32 to vector<1x128xf32>
    %7 = arith.mulf %2, %6 : vector<1x128xf32>
    %cst_11 = arith.constant 1.250000e-01 : f32
    %8 = vector.broadcast %cst_11 : f32 to vector<1x128xf32>
    %9 = arith.mulf %3, %8 : vector<1x128xf32>
    %10 = arith.mulf %7, %7 : vector<1x128xf32>
    %11 = arith.subf %9, %10 : vector<1x128xf32>
    %12 = vector.broadcast %7 : vector<1x128xf32> to vector<8x128xf32>
    %13 = arith.subf %1, %12 : vector<8x128xf32>
    %cst_12 = arith.constant 9.99999974E-6 : f32
    %14 = vector.broadcast %cst_12 : f32 to vector<1x128xf32>
    %15 = arith.addf %11, %14 : vector<1x128xf32>
    %16 = math.rsqrt %15 : vector<1x128xf32>
    %17 = vector.broadcast %16 : vector<1x128xf32> to vector<8x128xf32>
    %18 = arith.mulf %13, %17 : vector<8x128xf32>
    %19 = vector.broadcast %4 : vector<1x128xf32> to vector<8x128xf32>
    %20 = arith.mulf %18, %19 : vector<8x128xf32>
    %21 = vector.broadcast %5 : vector<1x128xf32> to vector<8x128xf32>
    %22 = arith.addf %20, %21 : vector<8x128xf32>
    %cst_13 = arith.constant 0.000000e+00 : f32
    %23 = vector.broadcast %cst_13 : f32 to vector<8x128xf32>
    %24 = arith.subf %23, %22 : vector<8x128xf32>
    %25 = math.exp %24 : vector<8x128xf32>
    %cst_14 = arith.constant 1.000000e+00 : f32
    %26 = vector.broadcast %cst_14 : f32 to vector<8x128xf32>
    %27 = arith.addf %26, %25 : vector<8x128xf32>
    %28 = tpu.reciprocal %27 : vector<8x128xf32> -> vector<8x128xf32>
    %29 = arith.mulf %22, %28 : vector<8x128xf32>
    %c0_15 = arith.constant 0 : index
    %c0_16 = arith.constant 0 : index
    %30 = vector.load %arg7[%c0_15, %c0_16] : memref<128x128xf32, #tpu.memory_space<vmem>>, vector<128x128xf32>
    %cst_17 = arith.constant dense<0.000000e+00> : vector<8x128xf32>
    %31 = tpu.matmul %29, %30, %cst_17 {dimension_numbers = #tpu.dot_dimension_numbers<[1], [1], [0], [0], [0, 0, 1, 0], [], []>} : vector<8x128xf32>, vector<128x128xf32>, vector<8x128xf32> -> vector<8x128xf32>
    %c0_18 = arith.constant 0 : index
    %c0_19 = arith.constant 0 : index
    %32 = vector.load %arg8[%c0_18, %c0_19] : memref<1x128xf32, #tpu.memory_space<vmem>>, vector<1x128xf32>
    %33 = vector.broadcast %32 : vector<1x128xf32> to vector<8x128xf32>
    %34 = arith.addf %31, %33 : vector<8x128xf32>
    %35 = arith.addf %34, %0 : vector<8x128xf32>
    %c0_20 = arith.constant 0 : index
    %c0_21 = arith.constant 0 : index
    %36 = vector.load %arg9[%c0_20, %c0_21] : memref<8x128xf32, #tpu.memory_space<vmem>>, vector<8x128xf32>
    tpu.vector_store %arg9[%c0_20, %c0_21], %35 {strides = array<i32>} : memref<8x128xf32, #tpu.memory_space<vmem>>, vector<8x128xf32>,
    return
  }
  func.func @transform_0(%arg0: i32) -> (i32, i32) {
    %c0_i32 = arith.constant 0 : i32
    %c0_i32_0 = arith.constant 0 : i32
    return %arg0, %c0_i32 : i32, i32
  }
  func.func @transform_1(%arg0: i32) -> (i32, i32) {
    %c0_i32 = arith.constant 0 : i32
    %c0_i32_0 = arith.constant 0 : i32
    return %arg0, %c0_i32 : i32, i32
  }
  func.func @transform_2(%arg0: i32) -> (i32, i32) {
    %c0_i32 = arith.constant 0 : i32
    %c0_i32_0 = arith.constant 0 : i32
    %c0_i32_1 = arith.constant 0 : i32
    return %c0_i32, %c0_i32_0 : i32, i32
  }
  func.func @transform_3(%arg0: i32) -> (i32, i32) {
    %c0_i32 = arith.constant 0 : i32
    %c0_i32_0 = arith.constant 0 : i32
    %c0_i32_1 = arith.constant 0 : i32
    return %c0_i32, %c0_i32_0 : i32, i32
  }
  func.func @transform_4(%arg0: i32) -> (i32, i32) {
    %c0_i32 = arith.constant 0 : i32
    %c0_i32_0 = arith.constant 0 : i32
    %c0_i32_1 = arith.constant 0 : i32
    return %c0_i32, %c0_i32_0 : i32, i32
  }
  func.func @transform_5(%arg0: i32) -> (i32, i32) {
    %c0_i32 = arith.constant 0 : i32
    %c0_i32_0 = arith.constant 0 : i32
    %c0_i32_1 = arith.constant 0 : i32
    return %c0_i32, %c0_i32_0 : i32, i32
  }
  func.func @transform_6(%arg0: i32) -> (i32, i32) {
    %c0_i32 = arith.constant 0 : i32
    %c0_i32_0 = arith.constant 0 : i32
    %c0_i32_1 = arith.constant 0 : i32
    return %c0_i32, %c0_i32_0 : i32, i32
  }
  func.func @transform_7(%arg0: i32) -> (i32, i32) {
    %c0_i32 = arith.constant 0 : i32
    %c0_i32_0 = arith.constant 0 : i32
    %c0_i32_1 = arith.constant 0 : i32
    return %c0_i32, %c0_i32_0 : i32, i32
  }
  func.func @transform_8(%arg0: i32) -> (i32, i32) {
    %c0_i32 = arith.constant 0 : i32
    %c0_i32_0 = arith.constant 0 : i32
    return %arg0, %c0_i32 : i32, i32
  }
}

module attributes {stable_mosaic.version = 11 : i64} {
  func.func @_fc1_kernel(%arg0: i32, %arg1: memref<8x128xf32, #tpu.memory_space<vmem>>, %arg2: memref<1x128xf32, #tpu.memory_space<vmem>>, %arg3: memref<1x128xf32, #tpu.memory_space<vmem>>, %arg4: memref<1x128xf32, #tpu.memory_space<vmem>>, %arg5: memref<1x128xf32, #tpu.memory_space<vmem>>, %arg6: memref<128x128xf32, #tpu.memory_space<vmem>>, %arg7: memref<1x128xf32, #tpu.memory_space<vmem>>, %arg8: memref<8x128xf32, #tpu.memory_space<vmem>>, %arg9: memref<1x128xf32, #tpu.memory_space<vmem>>, %arg10: memref<1x128xf32, #tpu.memory_space<vmem>>) attributes {dimension_semantics = [#tpu.dimension_semantics<arbitrary>], iteration_bounds = array<i64: 1>, scalar_prefetch = 0 : i64, scratch_operands = 0 : i64, tpu.core_type = #tpu.core_type<tc>, window_params = [{transform_indices = @transform_0, window_bounds = array<i64: 8, 128>}, {pipeline_mode = #tpu.pipeline_mode<synchronous>, transform_indices = @transform_1, window_bounds = array<i64: 1, 128>}, {pipeline_mode = #tpu.pipeline_mode<synchronous>, transform_indices = @transform_2, window_bounds = array<i64: 1, 128>}, {pipeline_mode = #tpu.pipeline_mode<synchronous>, transform_indices = @transform_3, window_bounds = array<i64: 1, 128>}, {pipeline_mode = #tpu.pipeline_mode<synchronous>, transform_indices = @transform_4, window_bounds = array<i64: 1, 128>}, {pipeline_mode = #tpu.pipeline_mode<synchronous>, transform_indices = @transform_5, window_bounds = array<i64: 128, 128>}, {pipeline_mode = #tpu.pipeline_mode<synchronous>, transform_indices = @transform_6, window_bounds = array<i64: 1, 128>}, {transform_indices = @transform_7, window_bounds = array<i64: 8, 128>}, {pipeline_mode = #tpu.pipeline_mode<synchronous>, transform_indices = @transform_8, window_bounds = array<i64: 1, 128>}, {pipeline_mode = #tpu.pipeline_mode<synchronous>, transform_indices = @transform_9, window_bounds = array<i64: 1, 128>}]} {
    %c0 = arith.constant 0 : index
    %c0_0 = arith.constant 0 : index
    %0 = vector.load %arg1[%c0, %c0_0] : memref<8x128xf32, #tpu.memory_space<vmem>>, vector<8x128xf32>
    %c0_1 = arith.constant 0 : index
    %c0_2 = arith.constant 0 : index
    %1 = vector.load %arg2[%c0_1, %c0_2] : memref<1x128xf32, #tpu.memory_space<vmem>>, vector<1x128xf32>
    %c0_3 = arith.constant 0 : index
    %c0_4 = arith.constant 0 : index
    %2 = vector.load %arg3[%c0_3, %c0_4] : memref<1x128xf32, #tpu.memory_space<vmem>>, vector<1x128xf32>
    %c0_5 = arith.constant 0 : index
    %c0_6 = arith.constant 0 : index
    %3 = vector.load %arg4[%c0_5, %c0_6] : memref<1x128xf32, #tpu.memory_space<vmem>>, vector<1x128xf32>
    %c0_7 = arith.constant 0 : index
    %c0_8 = arith.constant 0 : index
    %4 = vector.load %arg5[%c0_7, %c0_8] : memref<1x128xf32, #tpu.memory_space<vmem>>, vector<1x128xf32>
    %cst = arith.constant 1.250000e-01 : f32
    %5 = vector.broadcast %cst : f32 to vector<1x128xf32>
    %6 = arith.mulf %1, %5 : vector<1x128xf32>
    %cst_9 = arith.constant 1.250000e-01 : f32
    %7 = vector.broadcast %cst_9 : f32 to vector<1x128xf32>
    %8 = arith.mulf %2, %7 : vector<1x128xf32>
    %9 = arith.mulf %6, %6 : vector<1x128xf32>
    %10 = arith.subf %8, %9 : vector<1x128xf32>
    %11 = vector.broadcast %6 : vector<1x128xf32> to vector<8x128xf32>
    %12 = arith.subf %0, %11 : vector<8x128xf32>
    %cst_10 = arith.constant 9.99999974E-6 : f32
    %13 = vector.broadcast %cst_10 : f32 to vector<1x128xf32>
    %14 = arith.addf %10, %13 : vector<1x128xf32>
    %15 = math.rsqrt %14 : vector<1x128xf32>
    %16 = vector.broadcast %15 : vector<1x128xf32> to vector<8x128xf32>
    %17 = arith.mulf %12, %16 : vector<8x128xf32>
    %18 = vector.broadcast %3 : vector<1x128xf32> to vector<8x128xf32>
    %19 = arith.mulf %17, %18 : vector<8x128xf32>
    %20 = vector.broadcast %4 : vector<1x128xf32> to vector<8x128xf32>
    %21 = arith.addf %19, %20 : vector<8x128xf32>
    %cst_11 = arith.constant 0.000000e+00 : f32
    %22 = vector.broadcast %cst_11 : f32 to vector<8x128xf32>
    %23 = arith.subf %22, %21 : vector<8x128xf32>
    %24 = math.exp %23 : vector<8x128xf32>
    %cst_12 = arith.constant 1.000000e+00 : f32
    %25 = vector.broadcast %cst_12 : f32 to vector<8x128xf32>
    %26 = arith.addf %25, %24 : vector<8x128xf32>
    %27 = tpu.reciprocal %26 : vector<8x128xf32> -> vector<8x128xf32>
    %28 = arith.mulf %21, %27 : vector<8x128xf32>
    %c0_13 = arith.constant 0 : index
    %c0_14 = arith.constant 0 : index
    %29 = vector.load %arg6[%c0_13, %c0_14] : memref<128x128xf32, #tpu.memory_space<vmem>>, vector<128x128xf32>
    %cst_15 = arith.constant dense<0.000000e+00> : vector<8x128xf32>
    %30 = tpu.matmul %28, %29, %cst_15 {dimension_numbers = #tpu.dot_dimension_numbers<[1], [1], [0], [0], [0, 0, 1, 0], [], []>} : vector<8x128xf32>, vector<128x128xf32>, vector<8x128xf32> -> vector<8x128xf32>
    %c0_16 = arith.constant 0 : index
    %c0_17 = arith.constant 0 : index
    %31 = vector.load %arg7[%c0_16, %c0_17] : memref<1x128xf32, #tpu.memory_space<vmem>>, vector<1x128xf32>
    %32 = vector.broadcast %31 : vector<1x128xf32> to vector<8x128xf32>
    %33 = arith.addf %30, %32 : vector<8x128xf32>
    %c0_18 = arith.constant 0 : index
    %c0_19 = arith.constant 0 : index
    %34 = vector.load %arg8[%c0_18, %c0_19] : memref<8x128xf32, #tpu.memory_space<vmem>>, vector<8x128xf32>
    tpu.vector_store %arg8[%c0_18, %c0_19], %33 {strides = array<i32>} : memref<8x128xf32, #tpu.memory_space<vmem>>, vector<8x128xf32>,
    %c0_i32 = arith.constant 0 : i32
    %35 = arith.cmpi eq, %arg0, %c0_i32 : i32
    %36 = arith.extui %35 : i1 to i32
    %c0_i32_20 = arith.constant 0 : i32
    %37 = arith.cmpi ne, %36, %c0_i32_20 : i32
    scf.if %37 {
      %cst_31 = arith.constant 0.000000e+00 : f32
      %49 = vector.broadcast %cst_31 : f32 to vector<1x128xf32>
      %c0_32 = arith.constant 0 : index
      %c0_33 = arith.constant 0 : index
      %50 = vector.load %arg9[%c0_32, %c0_33] : memref<1x128xf32, #tpu.memory_space<vmem>>, vector<1x128xf32>
      tpu.vector_store %arg9[%c0_32, %c0_33], %49 {strides = array<i32>} : memref<1x128xf32, #tpu.memory_space<vmem>>, vector<1x128xf32>,
      %cst_34 = arith.constant 0.000000e+00 : f32
      %51 = vector.broadcast %cst_34 : f32 to vector<1x128xf32>
      %c0_35 = arith.constant 0 : index
      %c0_36 = arith.constant 0 : index
      %52 = vector.load %arg10[%c0_35, %c0_36] : memref<1x128xf32, #tpu.memory_space<vmem>>, vector<1x128xf32>
      tpu.vector_store %arg10[%c0_35, %c0_36], %51 {strides = array<i32>} : memref<1x128xf32, #tpu.memory_space<vmem>>, vector<1x128xf32>,
    } else {
    }
    %c0_21 = arith.constant 0 : index
    %c0_22 = arith.constant 0 : index
    %38 = vector.load %arg9[%c0_21, %c0_22] : memref<1x128xf32, #tpu.memory_space<vmem>>, vector<1x128xf32>
    %cst_23 = arith.constant dense<0.000000e+00> : vector<128xf32>
    %39 = vector.multi_reduction <add>, %33, %cst_23 [0] : vector<8x128xf32> to vector<128xf32>
    %40 = vector.shape_cast %39 : vector<128xf32> to vector<1x128xf32>
    %41 = arith.addf %38, %40 : vector<1x128xf32>
    %c0_24 = arith.constant 0 : index
    %c0_25 = arith.constant 0 : index
    %42 = vector.load %arg9[%c0_24, %c0_25] : memref<1x128xf32, #tpu.memory_space<vmem>>, vector<1x128xf32>
    tpu.vector_store %arg9[%c0_24, %c0_25], %41 {strides = array<i32>} : memref<1x128xf32, #tpu.memory_space<vmem>>, vector<1x128xf32>,
    %c0_26 = arith.constant 0 : index
    %c0_27 = arith.constant 0 : index
    %43 = vector.load %arg10[%c0_26, %c0_27] : memref<1x128xf32, #tpu.memory_space<vmem>>, vector<1x128xf32>
    %44 = arith.mulf %33, %33 : vector<8x128xf32>
    %cst_28 = arith.constant dense<0.000000e+00> : vector<128xf32>
    %45 = vector.multi_reduction <add>, %44, %cst_28 [0] : vector<8x128xf32> to vector<128xf32>
    %46 = vector.shape_cast %45 : vector<128xf32> to vector<1x128xf32>
    %47 = arith.addf %43, %46 : vector<1x128xf32>
    %c0_29 = arith.constant 0 : index
    %c0_30 = arith.constant 0 : index
    %48 = vector.load %arg10[%c0_29, %c0_30] : memref<1x128xf32, #tpu.memory_space<vmem>>, vector<1x128xf32>
    tpu.vector_store %arg10[%c0_29, %c0_30], %47 {strides = array<i32>} : memref<1x128xf32, #tpu.memory_space<vmem>>, vector<1x128xf32>,
    return
  }
  func.func @transform_0(%arg0: i32) -> (i32, i32) {
    %c0_i32 = arith.constant 0 : i32
    %c0_i32_0 = arith.constant 0 : i32
    return %arg0, %c0_i32 : i32, i32
  }
  func.func @transform_1(%arg0: i32) -> (i32, i32) {
    %c0_i32 = arith.constant 0 : i32
    %c0_i32_0 = arith.constant 0 : i32
    %c0_i32_1 = arith.constant 0 : i32
    return %c0_i32, %c0_i32_0 : i32, i32
  }
  func.func @transform_2(%arg0: i32) -> (i32, i32) {
    %c0_i32 = arith.constant 0 : i32
    %c0_i32_0 = arith.constant 0 : i32
    %c0_i32_1 = arith.constant 0 : i32
    return %c0_i32, %c0_i32_0 : i32, i32
  }
  func.func @transform_3(%arg0: i32) -> (i32, i32) {
    %c0_i32 = arith.constant 0 : i32
    %c0_i32_0 = arith.constant 0 : i32
    %c0_i32_1 = arith.constant 0 : i32
    return %c0_i32, %c0_i32_0 : i32, i32
  }
  func.func @transform_4(%arg0: i32) -> (i32, i32) {
    %c0_i32 = arith.constant 0 : i32
    %c0_i32_0 = arith.constant 0 : i32
    %c0_i32_1 = arith.constant 0 : i32
    return %c0_i32, %c0_i32_0 : i32, i32
  }
  func.func @transform_5(%arg0: i32) -> (i32, i32) {
    %c0_i32 = arith.constant 0 : i32
    %c0_i32_0 = arith.constant 0 : i32
    %c0_i32_1 = arith.constant 0 : i32
    return %c0_i32, %c0_i32_0 : i32, i32
  }
  func.func @transform_6(%arg0: i32) -> (i32, i32) {
    %c0_i32 = arith.constant 0 : i32
    %c0_i32_0 = arith.constant 0 : i32
    %c0_i32_1 = arith.constant 0 : i32
    return %c0_i32, %c0_i32_0 : i32, i32
  }
  func.func @transform_7(%arg0: i32) -> (i32, i32) {
    %c0_i32 = arith.constant 0 : i32
    %c0_i32_0 = arith.constant 0 : i32
    return %arg0, %c0_i32 : i32, i32
  }
  func.func @transform_8(%arg0: i32) -> (i32, i32) {
    %c0_i32 = arith.constant 0 : i32
    %c0_i32_0 = arith.constant 0 : i32
    %c0_i32_1 = arith.constant 0 : i32
    return %c0_i32, %c0_i32_0 : i32, i32
  }
  func.func @transform_9(%arg0: i32) -> (i32, i32) {
    %c0_i32 = arith.constant 0 : i32
    %c0_i32_0 = arith.constant 0 : i32
    %c0_i32_1 = arith.constant 0 : i32
    return %c0_i32, %c0_i32_0 : i32, i32
  }
}

</mosaic_0001>

<bundles_post_ra>
// kernel: residual_forward.3
= control target key start
LH: loop header
LB: loop body
LE: loop exit
PB: predicated region body
PF: predicated region fallthrough
CT: control target
= control target key end

     0   :  { %v45_v0 = vmov 0.0   ;;  %s82_s1 = inlined_call_operand.vmem [shape: f32[1,128], index: 1, kind: output, shape index: {0}]   ;;  %s83_s2 = inlined_call_operand.vmem [shape: f32[1,128], index: 2, kind: output, shape index: {1}]   ;;  %s84_s0 = inlined_call_operand.vmem [shape: f32[8,128], index: 0, kind: input, shape index: {}]  }
   0x1   :  { %15 = vst [vmem:[%s82_s1] sm:$0x1] %v45_v0  ;;  %v10_v1 = vld [vmem:[%s84_s0] sm:$0xff] }
   0x2   :  { %16 = vst [vmem:[%s83_s2] sm:$0x1] %v45_v0  ;;  %v18_v2 = vrot.slane %v10_v1, 4  ;;  %v27_v3 = vmul.f32 %v10_v1, %v10_v1 }
   0x4   :  { %v19_v4 = vadd.f32 %v18_v2, %v10_v1  ;;  %v28_v5 = vrot.slane %v27_v3, 4 }
   0x6   :  { %v20_v6 = vrot.slane %v19_v4, 2  ;;  %v29_v7 = vadd.f32 %v28_v5, %v27_v3 }
   0x8   :  { %v21_v8 = vadd.f32 %v20_v6, %v19_v4  ;;  %v30_v9 = vrot.slane %v29_v7, 2  ;;  %v17_v12 = vld [vmem:[%s82_s1] sm:$0x1] }
   0x9   :  { %v26_v15 = vld [vmem:[%s83_s2] sm:$0x1] }
   0xa   :  { %v22_v10 = vrot.slane %v21_v8, 1  ;;  %v31_v11 = vadd.f32 %v30_v9, %v29_v7 }
   0xc   :  { %v23_v13 = vadd.f32 %v22_v10, %v21_v8  ;;  %v32_v14 = vrot.slane %v31_v11, 1 }
   0xe   :  { %v24_v16 = vadd.f32 %v23_v13, %v17_v12  ;;  %v33_v17 = vadd.f32 %v32_v14, %v31_v11 }
  0x10   :  { %25 = vst [vmem:[%s82_s1] sm:$0x1] %v24_v16  ;;  %v34_v18 = vadd.f32 %v33_v17, %v26_v15 }
  0x12   :  { %35 = vst [vmem:[%s83_s2] sm:$0x1] %v34_v18 }

// kernel: residual_forward.5
= control target key start
LH: loop header
LB: loop body
LE: loop exit
PB: predicated region body
PF: predicated region fallthrough
CT: control target
= control target key end

     0   :  { %s298_s0 = inlined_call_operand.vmem [shape: f32[8,128], index: 0, kind: input, shape index: {}]   ;;  %s299_s1 = inlined_call_operand.vmem [shape: f32[8,128], index: 1, kind: input, shape index: {}]   ;;  %s300_s2 = inlined_call_operand.vmem [shape: f32[1,128], index: 2, kind: input, shape index: {}]   ;;  %s301_s3 = inlined_call_operand.vmem [shape: f32[1,128], index: 3, kind: input, shape index: {}]   ;;  %s302_s4 = inlined_call_operand.vmem [shape: f32[1,128], index: 4, kind: input, shape index: {}]   ;;  %s303_s5 = inlined_call_operand.vmem [shape: f32[1,128], index: 5, kind: input, shape index: {}]   ;;  %s304_s6 = inlined_call_operand.vmem [shape: f32[128,128], index: 6, kind: input, shape index: {}]   ;;  %s305_s7 = inlined_call_operand.vmem [shape: f32[1,128], index: 7, kind: input, shape index: {}]   ;;  %s306_s8 = inlined_call_operand.hbm [shape: f32[8,128], index: 8, kind: output, shape index: {}]  }
   0x1   :  { %v101_v0 = vld [vmem:[%s304_s6 + $0x78] sm:$0xff]  ;;  %v100_v1 = vld [vmem:[%s304_s6 + $0x70] sm:$0xff]  ;;  %v32_v2 = vld [vmem:[%s300_s2] sm:$0x1] }
   0x2   :  { %106 = vmatpush.xpose.msra.mxu0 %v101_v0  ;;  %v33_v3 = vld [vmem:[%s301_s3] sm:$0x1]  ;;  %v36_v4 = vmul.f32 0.125, %v32_v2  ;;  %v99_v6 = vld [vmem:[%s304_s6 + $0x68] sm:$0xff] }
   0x3   :  { %v37_v5 = vmul.f32 0.125, %v33_v3 }
   0x6   :  { %107 = vmatpush.xpose.msra.mxu0 %v100_v1 }
   0x7   :  { %13 = vsyncpa [#allocation3], 0  ;;  %v38_v7 = vmul.f32 %v36_v4, %v36_v4  ;;  %v98_v9 = vld [vmem:[%s304_s6 + $0x60] sm:$0xff]  ;;  %v97_v11 = vld [vmem:[%s304_s6 + $0x58] sm:$0xff]  ;;  %v41_v18 = vperm.slane %v36_v4, 0  ;;  %s180_s21 = smov [#allocation2]  }
   0x8   :  { %v96_v12 = vld [vmem:[%s304_s6 + $0x50] sm:$0xff]  ;;  %v95_v15 = vld [vmem:[%s304_s6 + $0x48] sm:$0xff]  ;;  %v94_v19 = vld [vmem:[%s304_s6 + $0x40] sm:$0xff]  ;;  %s133_s22 = sshll.u32 %s180_s21, 4  ;;  %s135_s25 = sshll.u32 %s306_s8, 4  ;;  %s134_s22 = int_to_ptr.vmem [resolvable:$true] %s133_s22  ;;  %s136_s25 = int_to_ptr.hbm [resolvable:$true] %s135_s25 }
   0x9   :  { %v39_v8 = vsub.f32 %v37_v5, %v38_v7  ;;  %v31_v20 = vld [vmem:[%s298_s0] sm:$0xff]  ;;  %v93_v24 = vld [vmem:[%s304_s6 + $0x38] sm:$0xff]  ;;  %v92_v30 = vld [vmem:[%s304_s6 + $0x30] sm:$0xff] }
   0xa   :  { %108 = vmatpush.xpose.msra.mxu0 %v99_v6  ;;  %v43_v23 = vsub.f32 %v31_v20, %v41_v18  ;;  %v145_v27 = vld [vmem:[%s302_s4] ss:$0 sm:$0xff]  ;;  %v91_v33 = vld [vmem:[%s304_s6 + $0x28] sm:$0xff]  ;;  %v89_v37 = vld [vmem:[%s304_s6 + $0x18] sm:$0xff] }
   0xb   :  { %v44_v10 = vadd.f32 1e-05, %v39_v8  ;;  %v146_v29 = vld [vmem:[%s303_s5] ss:$0 sm:$0xff]  ;;  %v88_v39 = vld [vmem:[%s304_s6 + $0x10] sm:$0xff]  ;;  %v87_v41 = vld [vmem:[%s304_s6 + $0x8] sm:$0xff] }
   0xc   :  { %v90_v36 = vld [vmem:[%s304_s6 + $0x20] sm:$0xff] }
   0xd   :  { %148 = vrsqrt.f32 %v44_v10  ;;  %vm51_vm0 = vweird.f32 %v44_v10  ;;  %v86_v43 = vld [vmem:[%s304_s6] sm:$0xff] }
   0xe   :  { %109 = vmatpush.xpose.msra.mxu0 %v98_v9  ;;  %v147_v54 = vld [vmem:[%s305_s7] ss:$0 sm:$0xff] }
   0xf   :  { %v30_v55 = vld [vmem:[%s299_s1] sm:$0xff] }
  0x12   :  { %110 = vmatpush.xpose.msra.mxu0 %v97_v11 }
  0x13   :  { %v149_v13 = vpop.eup %148 }
  0x14   :  { %v46_v14 = vmul.f32 %v149_v13, %v44_v10  ;;  %vm52_vm1 = vweird.f32 %v149_v13 }
  0x15   :  { %vm53_vm2 = vmor %vm51_vm0, %vm52_vm1 }
  0x16   :  { %111 = vmatpush.xpose.msra.mxu0 %v96_v12  ;;  %v47_v16 = vmul.f32 %v149_v13, %v46_v14 }
  0x18   :  { %v48_v17 = vmul.f32 0.5, %v47_v16 }
  0x1a   :  { %112 = vmatpush.xpose.msra.mxu0 %v95_v15  ;;  %v49_v21 = vsub.f32 1.5, %v48_v17 }
  0x1c   :  { %v50_v22 = vmul.f32 %v149_v13, %v49_v21 }
  0x1e   :  { %113 = vmatpush.xpose.msra.mxu0 %v94_v19  ;;  %v54_v25 = vsel %vm53_vm2, %v149_v13, %v50_v22 }
  0x1f   :  { %v56_v26 = vperm.slane %v54_v25, 0 }
  0x21   :  { %v58_v28 = vmul.f32 %v56_v26, %v43_v23 }
  0x22   :  { %114 = vmatpush.xpose.msra.mxu0 %v93_v24 }
  0x23   :  { %v62_v31 = vmul.f32 %v145_v27, %v58_v28 }
  0x25   :  { %v66_v32 = vadd.f32 %v146_v29, %v62_v31 }
  0x26   :  { %115 = vmatpush.xpose.msra.mxu0 %v92_v30 }
  0x27   :  { %v67_v34 = vsub.f32 0.0, %v66_v32 }
  0x29   :  { %v68_v35 = vmul.f32 1.442695, %v67_v34 }
  0x2a   :  { %116 = vmatpush.xpose.msra.mxu0 %v91_v33 }
  0x2b   :  { %150 = vpow2.f32 %v68_v35 }
  0x2e   :  { %117 = vmatpush.xpose.msra.mxu0 %v90_v36 }
  0x31   :  { %v151_v38 = vpop.eup %150 }
  0x32   :  { %118 = vmatpush.xpose.msra.mxu0 %v89_v37  ;;  %v70_v40 = vadd.f32 1.0, %v151_v38 }
  0x34   :  { %152 = vrcp.f32 %v70_v40  ;;  %v82_v45 = vand.u32 2147483648, %v70_v40  ;;  %vm76_vm3 = vweird.f32 %v70_v40  ;;  %v80_v47 = vand.u32 2147483647, %v70_v40 }
  0x36   :  { %119 = vmatpush.xpose.msra.mxu0 %v88_v39  ;;  %v83_v49 = vor.u32 1.1754944e-38, %v82_v45  ;;  %vm81_vm6 = vcmp.eq.f32.partialorder %v80_v47, 8.507059e+37 }
  0x3a   :  { %120 = vmatpush.xpose.msra.mxu0 %v87_v41  ;;  %v153_v42 = vpop.eup %152 }
  0x3b   :  { %v72_v44 = vmul.f32 %v153_v42, %v70_v40  ;;  %vm77_vm4 = vweird.f32 %v153_v42 }
  0x3c   :  { %vm78_vm5 = vmor %vm76_vm3, %vm77_vm4 }
  0x3d   :  { %v73_v46 = vsub.f32 1.0, %v72_v44 }
  0x3e   :  { %121 = vmatpush.xpose.msra.mxu0 %v86_v43 }
  0x3f   :  { %v74_v48 = vmul.f32 %v153_v42, %v73_v46 }
  0x41   :  { %v75_v50 = vadd.f32 %v153_v42, %v74_v48 }
  0x43   :  { %v79_v51 = vsel %vm78_vm5, %v153_v42, %v75_v50 }
  0x44   :  { %v84_v52 = vsel %vm81_vm6, %v83_v49, %v79_v51 }
  0x45   :  { %v85_v53 = vmul.f32 %v84_v52, %v66_v32 }
  0x47   :  { %122 = vmatmul.f32.vlgmr.msra.gmra.mxu0 %v85_v53 }
  0xc4   :  { %v123_v56 = vpop.f32.mrf.mxu0 }
  0xc5   :  { %v124_v57 = vadd.f32 %v147_v54, %v123_v56 }
  0xc7   :  { %v126_v58 = vadd.f32 %v124_v57, %v30_v55 }
  0xc9   :  { %127 = vst [vmem:[#allocation2] sm:$0xff] %v126_v58 }
  0xca   :  { %138 = dma.vmem_to_hbm [thread:$0]  %s134_s22, 128, %s136_s25, [#allocation3]  }
  0xcb   :  { %178 = dma.done.wait [#allocation3], 128  }
  0xcc   :  { %179 = vsyncadd [#allocation3], 4294967168 }
  0xcd   :  { %143 = vsyncpa [#allocation3], 1 }

// kernel: residual_forward.4
= control target key start
LH: loop header
LB: loop body
LE: loop exit
PB: predicated region body
PF: predicated region fallthrough
CT: control target
= control target key end

     0   :  { %v172_v54 = vmov 0.0   ;;  %s310_s5 = inlined_call_operand.vmem [shape: f32[128,128], index: 5, kind: input, shape index: {}]   ;;  %s311_s1 = inlined_call_operand.vmem [shape: f32[1,128], index: 1, kind: input, shape index: {}]   ;;  %s312_s2 = inlined_call_operand.vmem [shape: f32[1,128], index: 2, kind: input, shape index: {}]   ;;  %s313_s3 = inlined_call_operand.vmem [shape: f32[1,128], index: 3, kind: input, shape index: {}]   ;;  %s314_s4 = inlined_call_operand.vmem [shape: f32[1,128], index: 4, kind: input, shape index: {}]   ;;  %s315_s6 = inlined_call_operand.vmem [shape: f32[1,128], index: 6, kind: input, shape index: {}]   ;;  %s316_s0 = inlined_call_operand.vmem [shape: f32[8,128], index: 0, kind: input, shape index: {}]   ;;  %s317_s8 = inlined_call_operand.vmem [shape: f32[1,128], index: 8, kind: output, shape index: {1}]   ;;  %s318_s9 = inlined_call_operand.vmem [shape: f32[1,128], index: 9, kind: output, shape index: {2}]   ;;  %s319_s7 = inlined_call_operand.vmem [shape: f32[8,128], index: 7, kind: output, shape index: {0}]  }
   0x1   :  { %v99_v0 = vld [vmem:[%s310_s5 + $0x78] sm:$0xff]  ;;  %v98_v1 = vld [vmem:[%s310_s5 + $0x70] sm:$0xff]  ;;  %v30_v2 = vld [vmem:[%s311_s1] sm:$0x1]  ;;  %129 = vst [vmem:[%s317_s8] sm:$0x1] %v172_v54 }
   0x2   :  { %104 = vmatpush.xpose.msra.mxu0 %v99_v0  ;;  %v31_v3 = vld [vmem:[%s312_s2] sm:$0x1]  ;;  %v34_v4 = vmul.f32 0.125, %v30_v2  ;;  %v97_v6 = vld [vmem:[%s310_s5 + $0x68] sm:$0xff]  ;;  %v95_v11 = vld [vmem:[%s310_s5 + $0x58] sm:$0xff]  ;;  %130 = vst [vmem:[%s318_s9] sm:$0x1] %v172_v54 }
   0x3   :  { %v35_v5 = vmul.f32 0.125, %v31_v3  ;;  %v96_v9 = vld [vmem:[%s310_s5 + $0x60] sm:$0xff]  ;;  %v94_v12 = vld [vmem:[%s310_s5 + $0x50] sm:$0xff]  ;;  %v93_v15 = vld [vmem:[%s310_s5 + $0x48] sm:$0xff] }
   0x4   :  { %v36_v7 = vmul.f32 %v34_v4, %v34_v4  ;;  %v39_v18 = vperm.slane %v34_v4, 0  ;;  %v92_v19 = vld [vmem:[%s310_s5 + $0x40] sm:$0xff]  ;;  %v91_v24 = vld [vmem:[%s310_s5 + $0x38] sm:$0xff]  ;;  %v90_v30 = vld [vmem:[%s310_s5 + $0x30] sm:$0xff] }
   0x5   :  { %v29_v20 = vld [vmem:[%s316_s0] sm:$0xff]  ;;  %v89_v33 = vld [vmem:[%s310_s5 + $0x28] sm:$0xff]  ;;  %v87_v37 = vld [vmem:[%s310_s5 + $0x18] sm:$0xff] }
   0x6   :  { %105 = vmatpush.xpose.msra.mxu0 %v98_v1  ;;  %v37_v8 = vsub.f32 %v35_v5, %v36_v7  ;;  %v41_v23 = vsub.f32 %v29_v20, %v39_v18  ;;  %v163_v27 = vld [vmem:[%s313_s3] ss:$0 sm:$0xff]  ;;  %v86_v39 = vld [vmem:[%s310_s5 + $0x10] sm:$0xff]  ;;  %v85_v41 = vld [vmem:[%s310_s5 + $0x8] sm:$0xff] }
   0x7   :  { %v164_v29 = vld [vmem:[%s314_s4] ss:$0 sm:$0xff] }
   0x8   :  { %v42_v10 = vadd.f32 1e-05, %v37_v8  ;;  %v88_v36 = vld [vmem:[%s310_s5 + $0x20] sm:$0xff] }
   0x9   :  { %v84_v43 = vld [vmem:[%s310_s5] sm:$0xff] }
   0xa   :  { %106 = vmatpush.xpose.msra.mxu0 %v97_v6  ;;  %166 = vrsqrt.f32 %v42_v10  ;;  %vm49_vm0 = vweird.f32 %v42_v10  ;;  %v165_v55 = vld [vmem:[%s315_s6] ss:$0 sm:$0xff] }
   0xb   :  { %v131_v4 = vld [vmem:[%s317_s8] sm:$0x1] }
   0xc   :  { %v140_v7 = vld [vmem:[%s318_s9] sm:$0x1] }
   0xe   :  { %107 = vmatpush.xpose.msra.mxu0 %v96_v9 }
  0x10   :  { %v167_v13 = vpop.eup %166 }
  0x11   :  { %v44_v14 = vmul.f32 %v167_v13, %v42_v10  ;;  %vm50_vm1 = vweird.f32 %v167_v13 }
  0x12   :  { %108 = vmatpush.xpose.msra.mxu0 %v95_v11  ;;  %vm51_vm2 = vmor %vm49_vm0, %vm50_vm1 }
  0x13   :  { %v45_v16 = vmul.f32 %v167_v13, %v44_v14 }
  0x15   :  { %v46_v17 = vmul.f32 0.5, %v45_v16 }
  0x16   :  { %109 = vmatpush.xpose.msra.mxu0 %v94_v12 }
  0x17   :  { %v47_v21 = vsub.f32 1.5, %v46_v17 }
  0x19   :  { %v48_v22 = vmul.f32 %v167_v13, %v47_v21 }
  0x1a   :  { %110 = vmatpush.xpose.msra.mxu0 %v93_v15 }
  0x1b   :  { %v52_v25 = vsel %vm51_vm2, %v167_v13, %v48_v22 }
  0x1c   :  { %v54_v26 = vperm.slane %v52_v25, 0 }
  0x1e   :  { %111 = vmatpush.xpose.msra.mxu0 %v92_v19  ;;  %v56_v28 = vmul.f32 %v54_v26, %v41_v23 }
  0x20   :  { %v60_v31 = vmul.f32 %v163_v27, %v56_v28 }
  0x22   :  { %112 = vmatpush.xpose.msra.mxu0 %v91_v24  ;;  %v64_v32 = vadd.f32 %v164_v29, %v60_v31 }
  0x24   :  { %v65_v34 = vsub.f32 0.0, %v64_v32 }
  0x26   :  { %113 = vmatpush.xpose.msra.mxu0 %v90_v30  ;;  %v66_v35 = vmul.f32 1.442695, %v65_v34 }
  0x28   :  { %168 = vpow2.f32 %v66_v35 }
  0x2a   :  { %114 = vmatpush.xpose.msra.mxu0 %v89_v33 }
  0x2e   :  { %115 = vmatpush.xpose.msra.mxu0 %v88_v36  ;;  %v169_v38 = vpop.eup %168 }
  0x2f   :  { %v68_v40 = vadd.f32 1.0, %v169_v38 }
  0x31   :  { %170 = vrcp.f32 %v68_v40  ;;  %v80_v45 = vand.u32 2147483648, %v68_v40  ;;  %vm74_vm3 = vweird.f32 %v68_v40  ;;  %v78_v47 = vand.u32 2147483647, %v68_v40 }
  0x32   :  { %116 = vmatpush.xpose.msra.mxu0 %v87_v37 }
  0x33   :  { %v81_v49 = vor.u32 1.1754944e-38, %v80_v45  ;;  %vm79_vm6 = vcmp.eq.f32.partialorder %v78_v47, 8.507059e+37 }
  0x36   :  { %117 = vmatpush.xpose.msra.mxu0 %v86_v39 }
  0x37   :  { %v171_v42 = vpop.eup %170 }
  0x38   :  { %v70_v44 = vmul.f32 %v171_v42, %v68_v40  ;;  %vm75_vm4 = vweird.f32 %v171_v42 }
  0x39   :  { %vm76_vm5 = vmor %vm74_vm3, %vm75_vm4 }
  0x3a   :  { %118 = vmatpush.xpose.msra.mxu0 %v85_v41  ;;  %v71_v46 = vsub.f32 1.0, %v70_v44 }
  0x3c   :  { %v72_v48 = vmul.f32 %v171_v42, %v71_v46 }
  0x3e   :  { %119 = vmatpush.xpose.msra.mxu0 %v84_v43  ;;  %v73_v50 = vadd.f32 %v171_v42, %v72_v48 }
  0x40   :  { %v77_v51 = vsel %vm76_vm5, %v171_v42, %v73_v50 }
  0x41   :  { %v82_v52 = vsel %vm79_vm6, %v81_v49, %v77_v51 }
  0x42   :  { %v83_v53 = vmul.f32 %v82_v52, %v64_v32 }
  0x44   :  { %120 = vmatmul.f32.vlgmr.msra.gmra.mxu0 %v83_v53 }
  0xc1   :  { %v121_v56 = vpop.f32.mrf.mxu0 }
  0xc2   :  { %v122_v57 = vadd.f32 %v165_v55, %v121_v56 }
  0xc4   :  { %124 = vst [vmem:[%s319_s7] sm:$0xff] %v122_v57  ;;  %v132_v58 = vrot.slane %v122_v57, 4  ;;  %v141_v59 = vmul.f32 %v122_v57, %v122_v57 }
  0xc6   :  { %v133_v60 = vadd.f32 %v132_v58, %v122_v57  ;;  %v142_v61 = vrot.slane %v141_v59, 4 }
  0xc8   :  { %v134_v62 = vrot.slane %v133_v60, 2  ;;  %v143_v63 = vadd.f32 %v142_v61, %v141_v59 }
  0xca   :  { %v135_v0 = vadd.f32 %v134_v62, %v133_v60  ;;  %v144_v1 = vrot.slane %v143_v63, 2 }
  0xcc   :  { %v136_v2 = vrot.slane %v135_v0, 1  ;;  %v145_v3 = vadd.f32 %v144_v1, %v143_v63 }
  0xce   :  { %v137_v5 = vadd.f32 %v136_v2, %v135_v0  ;;  %v146_v6 = vrot.slane %v145_v3, 1 }
  0xd0   :  { %v138_v8 = vadd.f32 %v137_v5, %v131_v4  ;;  %v147_v9 = vadd.f32 %v146_v6, %v145_v3 }
  0xd2   :  { %139 = vst [vmem:[%s317_s8] sm:$0x1] %v138_v8  ;;  %v148_v10 = vadd.f32 %v147_v9, %v140_v7 }
  0xd4   :  { %149 = vst [vmem:[%s318_s9] sm:$0x1] %v148_v10 }

</bundles_post_ra>
